<compile_context>
chip_gen: v7x
topology: tpu7x:2x2x1
jax: 0.10.0
libtpu: 0.0.40
codegen_flags: <defaults>
</compile_context>

<pallas_src>
import functools

import jax
import jax.numpy as jnp
from jax.experimental import pallas as pl
from jax.experimental.pallas import tpu as pltpu


def _ffn_kernel(x_ref, w1_ref, b1_ref, w2_ref, b2_ref, o_ref, acc_ref):
    # x_ref : (tm, d_model)  bf16     w1_ref : (d_model, tff)  bf16
    # b1_ref: (1, tff)       f32      w2_ref : (tff, d_model)  bf16
    # b2_ref: (1, d_model)   f32      o_ref  : (tm, d_model)   out dtype
    # acc_ref: (tm, d_model) f32 scratch, resident across the d_ff (j) axis.
    j = pl.program_id(1)

    @pl.when(j == 0)
    def _():
        acc_ref[...] = jnp.zeros_like(acc_ref)

    # h_j = relu(x @ W1[:, j*tff:(j+1)*tff] + b1[j])   (f32 MXU accumulation)
    h = jnp.dot(x_ref[...], w1_ref[...], preferred_element_type=jnp.float32)
    h = jnp.maximum(h + b1_ref[...], 0.0)  # bias + ReLU on VPU, hidden under MXU
    # dropout: identity in eval mode.

    # acc += h_j @ W2[j*tff:(j+1)*tff, :]
    acc_ref[...] += jnp.dot(h.astype(w2_ref.dtype), w2_ref[...],
                            preferred_element_type=jnp.float32)

    @pl.when(j == pl.num_programs(1) - 1)
    def _():
        o_ref[...] = (acc_ref[...] + b2_ref[...]).astype(o_ref.dtype)


def _round_up(x, m):
    return (x + m - 1) // m * m


def _pick_row_tile(m, target=256):
    # Multiple of 8 (sublane); no larger than the padded problem or the target.
    return min(_round_up(m, 8), target)


def _pick_dff_tile(d_ff, target=512):
    # Largest multiple of 128 (lane) that divides d_ff and is <= target;
    # fall back to full d_ff for small / non-128-aligned hidden sizes.
    if d_ff <= target or d_ff % 128 != 0:
        return d_ff
    t = (target // 128) * 128
    while t >= 128:
        if d_ff % t == 0:
            return t
        t -= 128
    return d_ff


@functools.partial(jax.jit, static_argnames=("tm", "tff"))
def feed_forward(x, w1, b1, w2, b2, *, tm=None, tff=None):
    """x: (B, L, d_model). w1: (d_model, d_ff), b1: (d_ff,), w2: (d_ff, d_model),
    b2: (d_model,).  Returns (B, L, d_model) in x.dtype."""
    B, L, d_model = x.shape
    d_ff = w1.shape[1]
    M = B * L

    if tm is None:
        tm = _pick_row_tile(M)
    if tff is None:
        tff = _pick_dff_tile(d_ff)

    M_pad = _round_up(M, tm)

    # bf16 MXU inputs, f32 biases / accumulator.
    x2 = x.reshape(M, d_model).astype(jnp.bfloat16)
    if M_pad != M:
        x2 = jnp.pad(x2, ((0, M_pad - M), (0, 0)))
    w1b = w1.astype(jnp.bfloat16)
    w2b = w2.astype(jnp.bfloat16)
    b1f = b1.reshape(1, d_ff).astype(jnp.float32)
    b2f = b2.reshape(1, d_model).astype(jnp.float32)

    grid = (M_pad // tm, d_ff // tff)

    # VMEM: double-buffered bf16 inputs + double-buffered output + f32 scratch.
    out_bytes = jnp.dtype(x.dtype).itemsize
    vmem_need = (
        2 * 2 * (tm * d_model + d_model * tff + tff + tff * d_model + d_model)  # inputs, bf16-ish
        + 2 * tm * d_model * out_bytes                                          # output blocks
        + tm * d_model * 4                                                      # f32 accumulator
    )
    vmem_limit = int(min(128 * 1024 * 1024, max(32 * 1024 * 1024, 2 * vmem_need)))

    cost = pl.CostEstimate(
        flops=4 * M_pad * d_model * d_ff,
        transcendentals=0,
        bytes_accessed=(M_pad * d_model * 2                      # x (bf16 in)
                        + M_pad * d_model * out_bytes            # out
                        + grid[0] * (w1b.size + w2b.size) * 2    # weights per row tile
                        + grid[0] * (b1f.size + b2f.size) * 4),
    )

    out2 = pl.pallas_call(
        _ffn_kernel,
        out_shape=jax.ShapeDtypeStruct((M_pad, d_model), x.dtype),
        grid_spec=pltpu.PrefetchScalarGridSpec(
            num_scalar_prefetch=0,
            grid=grid,
            in_specs=[
                pl.BlockSpec((tm, d_model), lambda i, j: (i, 0)),   # x rows (constant over j)
                pl.BlockSpec((d_model, tff), lambda i, j: (0, j)),  # W1 column slab
                pl.BlockSpec((1, tff), lambda i, j: (0, j)),        # b1 slab
                pl.BlockSpec((tff, d_model), lambda i, j: (j, 0)),  # W2 row slab
                pl.BlockSpec((1, d_model), lambda i, j: (0, 0)),    # b2 (constant)
            ],
            out_specs=pl.BlockSpec((tm, d_model), lambda i, j: (i, 0)),
            scratch_shapes=[pltpu.VMEM((tm, d_model), jnp.float32)],
        ),
        compiler_params=pltpu.CompilerParams(
            dimension_semantics=("parallel", "arbitrary"),
            vmem_limit_bytes=vmem_limit,
        ),
        cost_estimate=cost,
    )(x2, w1b, b1f, w2b, b2f)

    return out2[:M].reshape(B, L, d_model)


def init_params(key, d_model, d_ff):
    """Deterministic init mimicking nn.Linear (uniform +/- 1/sqrt(fan_in)).
    Weights stored as (in_features, out_features) == transpose of PyTorch's."""
    k1, k2, k3, k4 = jax.random.split(key, 4)
    lim1 = 1.0 / jnp.sqrt(d_model)
    lim2 = 1.0 / jnp.sqrt(d_ff)
    w1 = jax.random.uniform(k1, (d_model, d_ff), jnp.float32, -lim1, lim1)
    b1 = jax.random.uniform(k2, (d_ff,), jnp.float32, -lim1, lim1)
    w2 = jax.random.uniform(k3, (d_ff, d_model), jnp.float32, -lim2, lim2)
    b2 = jax.random.uniform(k4, (d_model,), jnp.float32, -lim2, lim2)
    return w1, b1, w2, b2


if __name__ == "__main__":
    def reference(x, w1, b1, w2, b2):
        # eval-mode dropout == identity
        return jnp.maximum(x @ w1 + b1, 0.0) @ w2 + b2

    # --- Test 1: small shapes from the module spec ---------------------------
    batch, max_len, d_model, d_ff = 2, 8, 32, 64
    kx, kp = jax.random.split(jax.random.PRNGKey(0))
    x = jax.random.normal(kx, (batch, max_len, d_model), jnp.float32)
    w1, b1, w2, b2 = init_params(kp, d_model, d_ff)

    out = jax.block_until_ready(feed_forward(x, w1, b1, w2, b2))
    ref = reference(x, w1, b1, w2, b2)
    assert out.shape == x.shape
    # bf16 matmul inputs (f32 accumulation) -> relaxed tolerance vs f32 reference
    assert jnp.allclose(out, ref, atol=5e-2, rtol=5e-2), \
        float(jnp.max(jnp.abs(out - ref)))

    # --- Test 2: exercises M padding, multi-row-tile grid and the accumulating
    # d_ff axis (tff=128 -> 5 reduction steps) --------------------------------
    batch, max_len, d_model, d_ff = 4, 80, 128, 640
    kx, kp = jax.random.split(jax.random.PRNGKey(1))
    x = jax.random.normal(kx, (batch, max_len, d_model), jnp.float32)
    w1, b1, w2, b2 = init_params(kp, d_model, d_ff)

    out = jax.block_until_ready(feed_forward(x, w1, b1, w2, b2, tm=128, tff=128))
    ref = reference(x, w1, b1, w2, b2)
    assert out.shape == x.shape
    assert jnp.allclose(out, ref, atol=5e-2, rtol=5e-2), \
        float(jnp.max(jnp.abs(out - ref)))

    print("KERNEL_OK")
</pallas_src>

<mosaic_0001>
module attributes {stable_mosaic.version = 11 : i64} {
  func.func @_ffn_kernel(%arg0: i32, %arg1: i32, %arg2: memref<16x32xbf16, #tpu.memory_space<vmem>>, %arg3: memref<32x64xbf16, #tpu.memory_space<vmem>>, %arg4: memref<1x64xf32, #tpu.memory_space<vmem>>, %arg5: memref<64x32xbf16, #tpu.memory_space<vmem>>, %arg6: memref<1x32xf32, #tpu.memory_space<vmem>>, %arg7: memref<16x32xf32, #tpu.memory_space<vmem>>, %arg8: memref<16x32xf32, #tpu.memory_space<vmem>>) attributes {dimension_semantics = [#tpu.dimension_semantics<parallel>, #tpu.dimension_semantics<arbitrary>], iteration_bounds = array<i64: 1, 1>, scalar_prefetch = 0 : i64, scratch_operands = 1 : i64, tpu.core_type = #tpu.core_type<tc>, window_params = [{transform_indices = @transform_0, window_bounds = array<i64: 16, 32>}, {transform_indices = @transform_1, window_bounds = array<i64: 32, 64>}, {transform_indices = @transform_2, window_bounds = array<i64: 1, 64>}, {transform_indices = @transform_3, window_bounds = array<i64: 64, 32>}, {pipeline_mode = #tpu.pipeline_mode<synchronous>, transform_indices = @transform_4, window_bounds = array<i64: 1, 32>}, {transform_indices = @transform_5, window_bounds = array<i64: 16, 32>}]} {
    %c0_i32 = arith.constant 0 : i32
    %0 = arith.cmpi eq, %arg1, %c0_i32 : i32
    %1 = arith.extui %0 : i1 to i32
    %c0_i32_0 = arith.constant 0 : i32
    %2 = arith.cmpi ne, %1, %c0_i32_0 : i32
    scf.if %2 {
      %cst_16 = arith.constant 0.000000e+00 : f32
      %20 = vector.broadcast %cst_16 : f32 to vector<16x32xf32>
      %c0_17 = arith.constant 0 : index
      %c0_18 = arith.constant 0 : index
      %21 = vector.load %arg8[%c0_17, %c0_18] : memref<16x32xf32, #tpu.memory_space<vmem>>, vector<16x32xf32>
      tpu.vector_store %arg8[%c0_17, %c0_18], %20 {strides = array<i32>} : memref<16x32xf32, #tpu.memory_space<vmem>>, vector<16x32xf32>,
    } else {
    }
    %c0 = arith.constant 0 : index
    %c0_1 = arith.constant 0 : index
    %3 = vector.load %arg2[%c0, %c0_1] : memref<16x32xbf16, #tpu.memory_space<vmem>>, vector<16x32xbf16>
    %c0_2 = arith.constant 0 : index
    %c0_3 = arith.constant 0 : index
    %4 = vector.load %arg3[%c0_2, %c0_3] : memref<32x64xbf16, #tpu.memory_space<vmem>>, vector<32x64xbf16>
    %cst = arith.constant dense<0.000000e+00> : vector<16x64xf32>
    %5 = tpu.matmul %3, %4, %cst {dimension_numbers = #tpu.dot_dimension_numbers<[1], [0], [0], [1], [0, 0, 1, 1], [], []>} : vector<16x32xbf16>, vector<32x64xbf16>, vector<16x64xf32> -> vector<16x64xf32>
    %c0_4 = arith.constant 0 : index
    %c0_5 = arith.constant 0 : index
    %6 = vector.load %arg4[%c0_4, %c0_5] : memref<1x64xf32, #tpu.memory_space<vmem>>, vector<1x64xf32>
    %7 = vector.broadcast %6 : vector<1x64xf32> to vector<16x64xf32>
    %8 = arith.addf %5, %7 : vector<16x64xf32>
    %cst_6 = arith.constant 0.000000e+00 : f32
    %9 = vector.broadcast %cst_6 : f32 to vector<16x64xf32>
    %10 = arith.maximumf %8, %9 : vector<16x64xf32>
    %c0_7 = arith.constant 0 : index
    %c0_8 = arith.constant 0 : index
    %11 = vector.load %arg8[%c0_7, %c0_8] : memref<16x32xf32, #tpu.memory_space<vmem>>, vector<16x32xf32>
    %12 = arith.truncf %10 : vector<16x64xf32> to vector<16x64xbf16>
    %c0_9 = arith.constant 0 : index
    %c0_10 = arith.constant 0 : index
    %13 = vector.load %arg5[%c0_9, %c0_10] : memref<64x32xbf16, #tpu.memory_space<vmem>>, vector<64x32xbf16>
    %cst_11 = arith.constant dense<0.000000e+00> : vector<16x32xf32>
    %14 = tpu.matmul %12, %13, %cst_11 {dimension_numbers = #tpu.dot_dimension_numbers<[1], [0], [0], [1], [0, 0, 1, 1], [], []>} : vector<16x64xbf16>, vector<64x32xbf16>, vector<16x32xf32> -> vector<16x32xf32>
    %15 = arith.addf %11, %14 : vector<16x32xf32>
    %c0_12 = arith.constant 0 : index
    %c0_13 = arith.constant 0 : index
    %16 = vector.load %arg8[%c0_12, %c0_13] : memref<16x32xf32, #tpu.memory_space<vmem>>, vector<16x32xf32>
    tpu.vector_store %arg8[%c0_12, %c0_13], %15 {strides = array<i32>} : memref<16x32xf32, #tpu.memory_space<vmem>>, vector<16x32xf32>,
    %c0_i32_14 = arith.constant 0 : i32
    %17 = arith.cmpi eq, %arg1, %c0_i32_14 : i32
    %18 = arith.extui %17 : i1 to i32
    %c0_i32_15 = arith.constant 0 : i32
    %19 = arith.cmpi ne, %18, %c0_i32_15 : i32
    scf.if %19 {
      %c0_16 = arith.constant 0 : index
      %c0_17 = arith.constant 0 : index
      %20 = vector.load %arg8[%c0_16, %c0_17] : memref<16x32xf32, #tpu.memory_space<vmem>>, vector<16x32xf32>
      %c0_18 = arith.constant 0 : index
      %c0_19 = arith.constant 0 : index
      %21 = vector.load %arg6[%c0_18, %c0_19] : memref<1x32xf32, #tpu.memory_space<vmem>>, vector<1x32xf32>
      %22 = vector.broadcast %21 : vector<1x32xf32> to vector<16x32xf32>
      %23 = arith.addf %20, %22 : vector<16x32xf32>
      %c0_20 = arith.constant 0 : index
      %c0_21 = arith.constant 0 : index
      %24 = vector.load %arg7[%c0_20, %c0_21] : memref<16x32xf32, #tpu.memory_space<vmem>>, vector<16x32xf32>
      tpu.vector_store %arg7[%c0_20, %c0_21], %23 {strides = array<i32>} : memref<16x32xf32, #tpu.memory_space<vmem>>, vector<16x32xf32>,
    } else {
    }
    return
  }
  func.func @transform_0(%arg0: i32, %arg1: i32) -> (i32, i32) {
    %c0_i32 = arith.constant 0 : i32
    %c0_i32_0 = arith.constant 0 : i32
    return %arg0, %c0_i32 : i32, i32
  }
  func.func @transform_1(%arg0: i32, %arg1: i32) -> (i32, i32) {
    %c0_i32 = arith.constant 0 : i32
    %c0_i32_0 = arith.constant 0 : i32
    return %c0_i32, %arg1 : i32, i32
  }
  func.func @transform_2(%arg0: i32, %arg1: i32) -> (i32, i32) {
    %c0_i32 = arith.constant 0 : i32
    %c0_i32_0 = arith.constant 0 : i32
    return %c0_i32, %arg1 : i32, i32
  }
  func.func @transform_3(%arg0: i32, %arg1: i32) -> (i32, i32) {
    %c0_i32 = arith.constant 0 : i32
    %c0_i32_0 = arith.constant 0 : i32
    return %arg1, %c0_i32 : i32, i32
  }
  func.func @transform_4(%arg0: i32, %arg1: i32) -> (i32, i32) {
    %c0_i32 = arith.constant 0 : i32
    %c0_i32_0 = arith.constant 0 : i32
    %c0_i32_1 = arith.constant 0 : i32
    return %c0_i32, %c0_i32_0 : i32, i32
  }
  func.func @transform_5(%arg0: i32, %arg1: i32) -> (i32, i32) {
    %c0_i32 = arith.constant 0 : i32
    %c0_i32_0 = arith.constant 0 : i32
    return %arg0, %c0_i32 : i32, i32
  }
}

</mosaic_0001>

<bundles_post_ra>
// kernel: feed_forward.1
= control target key start
LH: loop header
LB: loop body
LE: loop exit
PB: predicated region body
PF: predicated region fallthrough
CT: control target
= control target key end

     0   :  { %v297_v1 = vmov 0.0   ;;  %vm298_vm0 = vmmov 0   ;;  %vm26_vm1 = vcmask 261120   ;;  %s378_s0 = inlined_call_operand.vmem [shape: bf16[16,32], index: 0, kind: input, shape index: {}]   ;;  %s379_s1 = inlined_call_operand.vmem [shape: bf16[32,64], index: 1, kind: input, shape index: {}]   ;;  %s380_s2 = inlined_call_operand.vmem [shape: f32[1,64], index: 2, kind: input, shape index: {}]   ;;  %s381_s3 = inlined_call_operand.vmem [shape: bf16[64,32], index: 3, kind: input, shape index: {}]   ;;  %s382_s4 = inlined_call_operand.vmem [shape: f32[1,32], index: 4, kind: input, shape index: {}]   ;;  %s383_s5 = inlined_call_operand.hbm [shape: f32[16,32], index: 5, kind: output, shape index: {}]  }
   0x1   :  { %v266_v0 = vld [vmem:[%s379_s1] sm:$0xff]   ;;  %241 = vmatprep.subr.bf16.mxu0 %v297_v1  ;;  %249 = vmatprep.subr.bf16.mxu1 %v297_v1  ;;  %v267_v2 = vld [vmem:[%s379_s1 + $0x8] sm:$0xff]   ;;  %27 = vst.msk [vmem:[#allocation2] sm:$0xff] %vm26_vm1, %v297_v1  ;;  %28 = vst.msk [vmem:[#allocation2 + $0x8] sm:$0xff] %vm26_vm1, %v297_v1 }
   0x2   :  { %242 = vmatpush3.bf16.msra.mxu0 %v266_v0  ;;  %245 = vmatprep.mubr.msk.bf16.mxu0 %vm298_vm0, %v297_v1  ;;  %v269_v3 = vld [vmem:[%s381_s3] sm:$0xff]   ;;  %v270_v5 = vld [vmem:[%s381_s3 + $0x8] sm:$0xff]  }
   0x3   :  { %243 = vmatprep.subr.bf16.mxu0 %v297_v1  ;;  %257 = vmatprep.mubr.msk.bf16.mxu1 %vm298_vm0, %v297_v1  ;;  %v268_v4 = vld [vmem:[%s378_s0] sm:$0xff]  }
   0x4   :  { %250 = vmatpush3.bf16.msra.mxu1 %v269_v3 }
   0x5   :  { %251 = vmatprep.subr.bf16.mxu1 %v297_v1 }
   0x6   :  { %244 = vmatpush3.bf16.msra.mxu0 %v267_v2 }
   0x7   :  { %10 = vsyncpa [#allocation4], 0  ;;  %v271_v6 = vld [vmem:[%s381_s3 + $0x10] sm:$0xff]   ;;  %v272_v7 = vld [vmem:[%s381_s3 + $0x18] sm:$0xff]   ;;  %vm141_vm2 = vcmask 523264   ;;  %s299_s7 = smov [#allocation3]  }
   0x8   :  { %252 = vmatpush3.bf16.msra.mxu1 %v270_v5  ;;  %v222_v8 = vld [vmem:[%s380_s2] ss:$0 sm:$0xff]  ;;  %v107_v20 = vld [vmem:[#allocation2 + $0x8] sm:$0xff]  ;;  %s211_s8 = sshll.u32 %s299_s7, 4  ;;  %s212_s8 = int_to_ptr.vmem [resolvable:$true] %s211_s8 }
   0x9   :  { %246 = vmatmul.mubr.msk.bf16.vlgmr.msra.gmra.mrb[0].mxu0 %vm26_vm1, %v268_v4  ;;  %253 = vmatprep.subr.bf16.mxu1 %v297_v1  ;;  %v106_v18 = vld [vmem:[#allocation2] sm:$0xff]  ;;  %s273_s9 = scalar_lea.vmem %s212_s8, 256  ;;  %p278_p1 = scmp.lt.s32.totalorder %s212_s8, %s212_s8 }
   0xa   :  { %v232_v26 = vld [vmem:[%s382_s4] ss:$0 sm:$0xff]  ;;  %p274_p0 = scmp.ne.s32.totalorder %s212_s8, %s273_s9  ;;  %p279_p2 = scmp.lt.s32.totalorder %s273_s9, %s273_s9 }
   0xc   :  { %254 = vmatpush3.bf16.msra.mxu1 %v271_v6  ;;  %p280_p3 = por %p279_p2, %p278_p1 }
   0xd   :  { %255 = vmatprep.subr.bf16.mxu1 %v297_v1 }
   0xe   :  { %p281_p4 = pnand %p280_p3, %p274_p0 }
  0x10   :  { %256 = vmatpush3.bf16.msra.mxu1 %v272_v7 }
  0xdc   :  { %v97_v9 = vpop.f32.mrb[0].mxu0 }
  0xdd   :  { %v98_v10 = vadd.f32 %v222_v8, %v97_v9  ;;  %v247_v11 = vpop.f32.mrb[1].mxu0 }
  0xde   :  { %v100_v12 = vpop.f32.mrb[2].mxu0 }
  0xdf   :  { %v101_v13 = vadd.f32 %v222_v8, %v100_v12  ;;  %v248_v14 = vpop.f32.mrb[3].mxu0  ;;  %v104_v15 = vmax.f32 %v98_v10, 0.0 }
  0xe1   :  { %v105_v16 = vmax.f32 %v101_v13, 0.0 }
  0xe3   :  { %v108_v17 = vpack.c.bf16 %v105_v16, %v104_v15 }
  0xe5   :  { %258 = vmatmul.mubr.msk.bf16.vlgmr.msra.gmra.mrb[0].mxu1 %vm141_vm2, %v108_v17 }
 0x1b8   :  { %v179_v19 = vpop.f32.mrb[0].mxu1 }
 0x1b9   :  { %v186_v21 = vadd.f32 %v179_v19, %v106_v18  ;;  %v259_v22 = vpop.f32.mrb[1].mxu1 }
 0x1ba   :  { %v182_v23 = vpop.f32.mrb[2].mxu1 }
 0x1bb   :  { %188 = vst.msk [vmem:[#allocation2] sm:$0xff] %vm26_vm1, %v186_v21  ;;  %v187_v24 = vadd.f32 %v182_v23, %v107_v20  ;;  %v260_v25 = vpop.f32.mrb[3].mxu1 }
 0x1bd   :  { %189 = vst.msk [vmem:[#allocation2 + $0x8] sm:$0xff] %vm26_vm1, %v187_v24 }
 0x1c2   :  { %v193_v27 = vld [vmem:[#allocation2] sm:$0xff] }
 0x1c3   :  { %v202_v28 = vadd.f32 %v232_v26, %v193_v27 }
 0x1c4   :  { %v194_v29 = vld [vmem:[#allocation2 + $0x8] sm:$0xff] }
 0x1c5   :  { %v203_v30 = vadd.f32 %v232_v26, %v194_v29  ;;  %204 = vst.msk [vmem:[#allocation3] sm:$0xff] %vm26_vm1, %v202_v28 }
 0x1c7   :  { %205 = vst.msk [vmem:[#allocation3 + $0x8] sm:$0xff] %vm26_vm1, %v203_v30 }
 0x1c8   :  { %284 = shalt.err (!%p281_p4)
}
 0x1c9   :  { %s285_s11 = scalar_lea.hbm %s383_s5, 256 }
 0x1ca   :  { %p286_p5 = scmp.ne.s32.totalorder %s383_s5, %s285_s11  ;;  %p289_p6 = scmp.lt.u32.totalorder %s285_s11, %s383_s5 }
 0x1cc   :  { %p291_p7 = pnand %p289_p6, %p286_p5 }
 0x1ce   :  { %294 = shalt.err (!%p291_p7)
}
 0x1cf   :  { %s300_s16 = smov 128   ;;  %s301_s17 = smov 8  }
 0x1d0   :  { %217 = dma.vmem_to_hbm [thread:$0]  %s212_s8, 256, %s383_s5, [#allocation4], %s300_s16, %s300_s16, %s301_s17  }
 0x1d1   :  { %295 = dma.done.wait [#allocation4], 256  }
 0x1d2   :  { %296 = vsyncadd [#allocation4], 4294967040 }
 0x1d3   :  { %221 = vsyncpa [#allocation4], 1 }

</bundles_post_ra>
